<compile_context>
chip_gen: v7x
topology: tpu7x:2x2x1
jax: 0.10.0
libtpu: 0.0.40
codegen_flags: <defaults>
</compile_context>

<pallas_src>
import functools

import jax
import jax.numpy as jnp
from jax.experimental import pallas as pl
from jax.experimental.pallas import tpu as pltpu

LANE = 128


def _round_up(x: int, m: int) -> int:
    return ((x + m - 1) // m) * m


def actor_kernel(x_ref, w1_ref, b1_ref, w2_ref, b2_ref, w3_ref, b3_ref, out_ref):
    # One batch tile (TB, in_pad) per grid step; weights are VMEM-resident
    # across all steps (constant index_map).  Three chained MXU matmuls with
    # f32 accumulation, VPU relu, EUP tanh.
    x = x_ref[...]
    h1 = jnp.dot(x, w1_ref[...], preferred_element_type=jnp.float32) + b1_ref[...]
    h1 = jnp.maximum(h1, 0.0)
    h2 = jnp.dot(h1, w2_ref[...], preferred_element_type=jnp.float32) + b2_ref[...]
    h2 = jnp.maximum(h2, 0.0)
    h3 = jnp.dot(h2, w3_ref[...], preferred_element_type=jnp.float32) + b3_ref[...]
    out_ref[...] = jnp.tanh(h3)


@functools.partial(jax.jit, static_argnames=("block_b",))
def actor_forward(state, params, block_b: int = 256):
    """state: [B, input_dim] float32.  params: dict of transposed weights/biases.

    Weights are stored already transposed to (in, out); biases as (1, out).
    """
    w1, b1, w2, b2, w3, b3 = (params["w1"], params["b1"], params["w2"],
                              params["b2"], params["w3"], params["b3"])
    B, in_dim = state.shape
    density = w1.shape[1]
    n_actions = w3.shape[1]

    # Lane-dense padding for the first matmul's K dim and the output width.
    in_pad = _round_up(in_dim, LANE)
    out_pad = _round_up(n_actions, LANE)

    # Batch tile: multiple of 256 when the batch is large (v6e/v7x MXU rows,
    # also a multiple of 128 for v5e); fall back to an 8-aligned tile for tiny
    # batches so the (8, 128) block constraint is still met.
    tb = block_b if B >= block_b else _round_up(B, 8)
    b_pad = _round_up(B, tb)

    x = jnp.pad(state, ((0, b_pad - B), (0, in_pad - in_dim)))
    w1p = jnp.pad(w1, ((0, in_pad - in_dim), (0, 0)))
    w3p = jnp.pad(w3, ((0, 0), (0, out_pad - n_actions)))
    b3p = jnp.pad(b3, ((0, 0), (0, out_pad - n_actions)))

    grid = (b_pad // tb,)

    # Weights/biases: full-array blocks, constant index_map -> fetched once,
    # pinned in VMEM across all grid steps.
    def pinned(arr):
        return pl.BlockSpec(arr.shape, lambda i: (0, 0))

    flops = 2 * b_pad * (in_pad * density + density * density + density * out_pad)
    bytes_accessed = 4 * (
        b_pad * in_pad                     # state in
        + in_pad * density + density       # w1, b1
        + density * density + density      # w2, b2
        + density * out_pad + out_pad      # w3, b3
        + b_pad * out_pad                  # out
    )
    cost = pl.CostEstimate(
        flops=flops,
        transcendentals=b_pad * out_pad,   # tanh on the (padded) output
        bytes_accessed=bytes_accessed,
    )

    out = pl.pallas_call(
        actor_kernel,
        out_shape=jax.ShapeDtypeStruct((b_pad, out_pad), jnp.float32),
        grid=grid,
        in_specs=[
            pl.BlockSpec((tb, in_pad), lambda i: (i, 0)),
            pinned(w1p), pinned(b1),
            pinned(w2), pinned(b2),
            pinned(w3p), pinned(b3p),
        ],
        out_specs=pl.BlockSpec((tb, out_pad), lambda i: (i, 0)),
        compiler_params=pltpu.CompilerParams(
            dimension_semantics=("parallel",),
        ),
        cost_estimate=cost,
    )(x, w1p, b1, w2, b2, w3p, b3p)

    return out[:B, :n_actions]


def init_actor_params(key, input_dim, n_actions, density):
    """Deterministic init mirroring PyTorch Linear default (U(-1/sqrt(fan_in), +))."""
    ks = jax.random.split(key, 6)

    def linear(kw, kb, fan_in, fan_out):
        bound = 1.0 / jnp.sqrt(jnp.float32(fan_in))
        # Stored already transposed: (in, out)
        w = jax.random.uniform(kw, (fan_in, fan_out), jnp.float32, -bound, bound)
        b = jax.random.uniform(kb, (1, fan_out), jnp.float32, -bound, bound)
        return w, b

    w1, b1 = linear(ks[0], ks[1], input_dim, density)
    w2, b2 = linear(ks[2], ks[3], density, density)
    w3, b3 = linear(ks[4], ks[5], density, n_actions)
    return {"w1": w1, "b1": b1, "w2": w2, "b2": b2, "w3": w3, "b3": b3}


if __name__ == "__main__":
    # Batched rollout-style shapes: many env states in one call so the kernel
    # amortizes launch overhead (2 grid steps of a 256-row batch tile).
    B, INPUT_DIM, DENSITY, N_ACTIONS = 512, 16, 128, 4

    key = jax.random.PRNGKey(0)
    k_state, k_params = jax.random.split(key)

    state = jax.random.normal(k_state, (B, INPUT_DIM), jnp.float32)
    params = init_actor_params(k_params, INPUT_DIM, N_ACTIONS, DENSITY)

    action = actor_forward(state, params)
    action = jax.block_until_ready(action)

    # Pure-JAX reference check (same math as the PyTorch forward), f32 matmuls.
    hp = jax.lax.Precision.HIGHEST
    h1 = jnp.maximum(jnp.dot(state, params["w1"], precision=hp) + params["b1"], 0.0)
    h2 = jnp.maximum(jnp.dot(h1, params["w2"], precision=hp) + params["b2"], 0.0)
    ref = jnp.tanh(jnp.dot(h2, params["w3"], precision=hp) + params["b3"])

    assert action.shape == (B, N_ACTIONS)
    assert jnp.allclose(action, ref, atol=1e-5, rtol=1e-5)

    print("KERNEL_OK")
</pallas_src>

<mosaic_0001>
module attributes {stable_mosaic.version = 11 : i64} {
  func.func @actor_kernel(%arg0: i32, %arg1: memref<256x128xf32, #tpu.memory_space<vmem>>, %arg2: memref<128x128xf32, #tpu.memory_space<vmem>>, %arg3: memref<1x128xf32, #tpu.memory_space<vmem>>, %arg4: memref<128x128xf32, #tpu.memory_space<vmem>>, %arg5: memref<1x128xf32, #tpu.memory_space<vmem>>, %arg6: memref<128x128xf32, #tpu.memory_space<vmem>>, %arg7: memref<1x128xf32, #tpu.memory_space<vmem>>, %arg8: memref<256x128xf32, #tpu.memory_space<vmem>>) attributes {dimension_semantics = [#tpu.dimension_semantics<parallel>], iteration_bounds = array<i64: 2>, scalar_prefetch = 0 : i64, scratch_operands = 0 : i64, tpu.core_type = #tpu.core_type<tc>, window_params = [{transform_indices = @transform_0, window_bounds = array<i64: 256, 128>}, {pipeline_mode = #tpu.pipeline_mode<synchronous>, transform_indices = @transform_1, window_bounds = array<i64: 128, 128>}, {pipeline_mode = #tpu.pipeline_mode<synchronous>, transform_indices = @transform_2, window_bounds = array<i64: 1, 128>}, {pipeline_mode = #tpu.pipeline_mode<synchronous>, transform_indices = @transform_3, window_bounds = array<i64: 128, 128>}, {pipeline_mode = #tpu.pipeline_mode<synchronous>, transform_indices = @transform_4, window_bounds = array<i64: 1, 128>}, {pipeline_mode = #tpu.pipeline_mode<synchronous>, transform_indices = @transform_5, window_bounds = array<i64: 128, 128>}, {pipeline_mode = #tpu.pipeline_mode<synchronous>, transform_indices = @transform_6, window_bounds = array<i64: 1, 128>}, {transform_indices = @transform_7, window_bounds = array<i64: 256, 128>}]} {
    %c0 = arith.constant 0 : index
    %c0_0 = arith.constant 0 : index
    %0 = vector.load %arg1[%c0, %c0_0] : memref<256x128xf32, #tpu.memory_space<vmem>>, vector<256x128xf32>
    %c0_1 = arith.constant 0 : index
    %c0_2 = arith.constant 0 : index
    %1 = vector.load %arg2[%c0_1, %c0_2] : memref<128x128xf32, #tpu.memory_space<vmem>>, vector<128x128xf32>
    %cst = arith.constant dense<0.000000e+00> : vector<256x128xf32>
    %2 = tpu.matmul %0, %1, %cst {dimension_numbers = #tpu.dot_dimension_numbers<[1], [0], [0], [1], [0, 0, 1, 1], [], []>} : vector<256x128xf32>, vector<128x128xf32>, vector<256x128xf32> -> vector<256x128xf32>
    %c0_3 = arith.constant 0 : index
    %c0_4 = arith.constant 0 : index
    %3 = vector.load %arg3[%c0_3, %c0_4] : memref<1x128xf32, #tpu.memory_space<vmem>>, vector<1x128xf32>
    %4 = vector.broadcast %3 : vector<1x128xf32> to vector<256x128xf32>
    %5 = arith.addf %2, %4 : vector<256x128xf32>
    %cst_5 = arith.constant 0.000000e+00 : f32
    %6 = vector.broadcast %cst_5 : f32 to vector<256x128xf32>
    %7 = arith.maximumf %5, %6 : vector<256x128xf32>
    %c0_6 = arith.constant 0 : index
    %c0_7 = arith.constant 0 : index
    %8 = vector.load %arg4[%c0_6, %c0_7] : memref<128x128xf32, #tpu.memory_space<vmem>>, vector<128x128xf32>
    %cst_8 = arith.constant dense<0.000000e+00> : vector<256x128xf32>
    %9 = tpu.matmul %7, %8, %cst_8 {dimension_numbers = #tpu.dot_dimension_numbers<[1], [0], [0], [1], [0, 0, 1, 1], [], []>} : vector<256x128xf32>, vector<128x128xf32>, vector<256x128xf32> -> vector<256x128xf32>
    %c0_9 = arith.constant 0 : index
    %c0_10 = arith.constant 0 : index
    %10 = vector.load %arg5[%c0_9, %c0_10] : memref<1x128xf32, #tpu.memory_space<vmem>>, vector<1x128xf32>
    %11 = vector.broadcast %10 : vector<1x128xf32> to vector<256x128xf32>
    %12 = arith.addf %9, %11 : vector<256x128xf32>
    %cst_11 = arith.constant 0.000000e+00 : f32
    %13 = vector.broadcast %cst_11 : f32 to vector<256x128xf32>
    %14 = arith.maximumf %12, %13 : vector<256x128xf32>
    %c0_12 = arith.constant 0 : index
    %c0_13 = arith.constant 0 : index
    %15 = vector.load %arg6[%c0_12, %c0_13] : memref<128x128xf32, #tpu.memory_space<vmem>>, vector<128x128xf32>
    %cst_14 = arith.constant dense<0.000000e+00> : vector<256x128xf32>
    %16 = tpu.matmul %14, %15, %cst_14 {dimension_numbers = #tpu.dot_dimension_numbers<[1], [0], [0], [1], [0, 0, 1, 1], [], []>} : vector<256x128xf32>, vector<128x128xf32>, vector<256x128xf32> -> vector<256x128xf32>
    %c0_15 = arith.constant 0 : index
    %c0_16 = arith.constant 0 : index
    %17 = vector.load %arg7[%c0_15, %c0_16] : memref<1x128xf32, #tpu.memory_space<vmem>>, vector<1x128xf32>
    %18 = vector.broadcast %17 : vector<1x128xf32> to vector<256x128xf32>
    %19 = arith.addf %16, %18 : vector<256x128xf32>
    %20 = math.tanh %19 : vector<256x128xf32>
    %c0_17 = arith.constant 0 : index
    %c0_18 = arith.constant 0 : index
    %21 = vector.load %arg8[%c0_17, %c0_18] : memref<256x128xf32, #tpu.memory_space<vmem>>, vector<256x128xf32>
    tpu.vector_store %arg8[%c0_17, %c0_18], %20 {strides = array<i32>} : memref<256x128xf32, #tpu.memory_space<vmem>>, vector<256x128xf32>,
    return
  }
  func.func @transform_0(%arg0: i32) -> (i32, i32) {
    %c0_i32 = arith.constant 0 : i32
    %c0_i32_0 = arith.constant 0 : i32
    return %arg0, %c0_i32 : i32, i32
  }
  func.func @transform_1(%arg0: i32) -> (i32, i32) {
    %c0_i32 = arith.constant 0 : i32
    %c0_i32_0 = arith.constant 0 : i32
    %c0_i32_1 = arith.constant 0 : i32
    return %c0_i32, %c0_i32_0 : i32, i32
  }
  func.func @transform_2(%arg0: i32) -> (i32, i32) {
    %c0_i32 = arith.constant 0 : i32
    %c0_i32_0 = arith.constant 0 : i32
    %c0_i32_1 = arith.constant 0 : i32
    return %c0_i32, %c0_i32_0 : i32, i32
  }
  func.func @transform_3(%arg0: i32) -> (i32, i32) {
    %c0_i32 = arith.constant 0 : i32
    %c0_i32_0 = arith.constant 0 : i32
    %c0_i32_1 = arith.constant 0 : i32
    return %c0_i32, %c0_i32_0 : i32, i32
  }
  func.func @transform_4(%arg0: i32) -> (i32, i32) {
    %c0_i32 = arith.constant 0 : i32
    %c0_i32_0 = arith.constant 0 : i32
    %c0_i32_1 = arith.constant 0 : i32
    return %c0_i32, %c0_i32_0 : i32, i32
  }
  func.func @transform_5(%arg0: i32) -> (i32, i32) {
    %c0_i32 = arith.constant 0 : i32
    %c0_i32_0 = arith.constant 0 : i32
    %c0_i32_1 = arith.constant 0 : i32
    return %c0_i32, %c0_i32_0 : i32, i32
  }
  func.func @transform_6(%arg0: i32) -> (i32, i32) {
    %c0_i32 = arith.constant 0 : i32
    %c0_i32_0 = arith.constant 0 : i32
    %c0_i32_1 = arith.constant 0 : i32
    return %c0_i32, %c0_i32_0 : i32, i32
  }
  func.func @transform_7(%arg0: i32) -> (i32, i32) {
    %c0_i32 = arith.constant 0 : i32
    %c0_i32_0 = arith.constant 0 : i32
    return %arg0, %c0_i32 : i32, i32
  }
}

</mosaic_0001>

<bundles_post_ra>
// kernel: actor_forward.1
= control target key start
LH: loop header
LB: loop body
LE: loop exit
PB: predicated region body
PF: predicated region fallthrough
CT: control target
= control target key end

     0   :  { %s1872_s24 = smov 0   ;;  %s2240_s0 = inlined_call_operand.vmem [shape: f32[512,128], index: 0, kind: input, shape index: {}]   ;;  %s2241_s1 = inlined_call_operand.vmem [shape: f32[128,128], index: 1, kind: input, shape index: {}]   ;;  %s2242_s2 = inlined_call_operand.vmem [shape: f32[1,128], index: 2, kind: input, shape index: {}]   ;;  %s2243_s3 = inlined_call_operand.vmem [shape: f32[128,128], index: 3, kind: input, shape index: {}]   ;;  %s2244_s4 = inlined_call_operand.vmem [shape: f32[1,128], index: 4, kind: input, shape index: {}]   ;;  %s2245_s5 = inlined_call_operand.vmem [shape: f32[128,128], index: 5, kind: input, shape index: {}]   ;;  %s2246_s6 = inlined_call_operand.vmem [shape: f32[1,128], index: 6, kind: input, shape index: {}]   ;;  %s2247_s7 = inlined_call_operand.vmem [shape: f32[512,128], index: 7, kind: output, shape index: {}]  }
   0x1 LB: > { %s1242_s25 = sadd.s32 4294967295, %s1830_s24   ;;  %p1246_p0 = scmp.ge.s32.totalorder %s1830_s24, 1  ;;  %s1830_s24 = sphi %s1872_s24, %s17_s24  }
   0x2   : > { %p238_p1 = scmp.lt.s32.totalorder %s1830_s24, 3 }
   0x4   : > { %p239_p2 = pnand %p1246_p0, %p238_p1 }
   0x5   : > { %v314_v0 = vld [vmem:[%s2241_s1] sm:$0xff] (!%p239_p2)  ;;  %v315_v1 = vld [vmem:[%s2241_s1 + $0x8] sm:$0xff] (!%p239_p2)  ;;  %v316_v2 = vld [vmem:[%s2241_s1 + $0x10] sm:$0xff] (!%p239_p2)  ;;  %s1247_s9 = sshll.u32 (!%p239_p2), %s1242_s25, 5 }
   0x6   : > { %242 = sbr.rel (%p239_p2) target bundleno = 763 (0x2fb), region = 48  ;;  %v1640_v3 = vpack.c.bf16 (!%p239_p2), %v315_v1, %v314_v0  ;;  %v317_v4 = vld [vmem:[%s2241_s1 + $0x18] sm:$0xff] (!%p239_p2)  ;;  %p271_p3 = scmp.lt.s32.totalorder (!%p239_p2), %s1247_s9, 63  ;;  %v318_v6 = vld [vmem:[%s2241_s1 + $0x20] sm:$0xff] (!%p239_p2)  ;;  %v319_v7 = vld [vmem:[%s2241_s1 + $0x28] sm:$0xff] (!%p239_p2) }
   0x7   : > { %v1644_v5 = vpack.c.bf16 (!%p239_p2), %v317_v4, %v316_v2  ;;  %v1648_v8 = vpack.c.bf16 (!%p239_p2), %v319_v7, %v318_v6  ;;  %v320_v9 = vld [vmem:[%s2241_s1 + $0x30] sm:$0xff] (!%p239_p2)  ;;  %v321_v10 = vld [vmem:[%s2241_s1 + $0x38] sm:$0xff] (!%p239_p2)  ;;  %v322_v13 = vld [vmem:[%s2241_s1 + $0x40] sm:$0xff] (!%p239_p2) }
   0x8   : > { %1641 = vmatprep.subr.bf16.mxu0 (!%p239_p2), %v1640_v3  ;;  %1736 = vmatprep.subr.bf16.mxu1 (!%p239_p2), %v1640_v3  ;;  %v1652_v12 = vpack.c.bf16 (!%p239_p2), %v321_v10, %v320_v9  ;;  %v323_v14 = vld [vmem:[%s2241_s1 + $0x48] sm:$0xff] (!%p239_p2)  ;;  %v324_v17 = vld [vmem:[%s2241_s1 + $0x50] sm:$0xff] (!%p239_p2)  ;;  %v325_v18 = vld [vmem:[%s2241_s1 + $0x58] sm:$0xff] (!%p239_p2) }
   0x9   : > { %1643 = vmatpush3.bf16.msra.mxu0 (!%p239_p2), %v1640_v3  ;;  %1744 = vmatpush3.bf16.msra.mxu1 (!%p239_p2), %v1640_v3  ;;  %v1656_v16 = vpack.c.bf16 (!%p239_p2), %v323_v14, %v322_v13  ;;  %v1660_v19 = vpack.c.bf16 (!%p239_p2), %v325_v18, %v324_v17  ;;  %v326_v20 = vld [vmem:[%s2241_s1 + $0x60] sm:$0xff] (!%p239_p2)  ;;  %v327_v21 = vld [vmem:[%s2241_s1 + $0x68] sm:$0xff] (!%p239_p2)  ;;  %v328_v23 = vld [vmem:[%s2241_s1 + $0x70] sm:$0xff] (!%p239_p2) }
   0xa   : > { %1645 = vmatprep.subr.bf16.mxu0 (!%p239_p2), %v1644_v5  ;;  %1737 = vmatprep.subr.bf16.mxu1 (!%p239_p2), %v1644_v5  ;;  %v1664_v22 = vpack.c.bf16 (!%p239_p2), %v327_v21, %v326_v20  ;;  %v329_v24 = vld [vmem:[%s2241_s1 + $0x78] sm:$0xff] (!%p239_p2)  ;;  %v594_v26 = vld [vmem:[%s2243_s3] sm:$0xff] (!%p239_p2)  ;;  %v595_v27 = vld [vmem:[%s2243_s3 + $0x8] sm:$0xff] (!%p239_p2) }
   0xb   : > { %v1668_v25 = vpack.c.bf16 (!%p239_p2), %v329_v24, %v328_v23  ;;  %v1672_v28 = vpack.c.bf16 (!%p239_p2), %v595_v27, %v594_v26  ;;  %v596_v29 = vld [vmem:[%s2243_s3 + $0x10] sm:$0xff] (!%p239_p2)  ;;  %v597_v30 = vld [vmem:[%s2243_s3 + $0x18] sm:$0xff] (!%p239_p2)  ;;  %v598_v36 = vld [vmem:[%s2243_s3 + $0x20] sm:$0xff] (!%p239_p2) }
   0xc   : > { %v1676_v35 = vpack.c.bf16 (!%p239_p2), %v597_v30, %v596_v29  ;;  %v599_v37 = vld [vmem:[%s2243_s3 + $0x28] sm:$0xff] (!%p239_p2)  ;;  %v600_v43 = vld [vmem:[%s2243_s3 + $0x30] sm:$0xff] (!%p239_p2)  ;;  %v601_v44 = vld [vmem:[%s2243_s3 + $0x38] sm:$0xff] (!%p239_p2) }
   0xd   : > { %s2249_s9 = smov (!%p271_p3, %s1247_s9), 63  ;;  %1647 = vmatpush3.bf16.msra.mxu0 %v1644_v5  ;;  %1745 = vmatpush3.bf16.msra.mxu1 %v1644_v5  ;;  %v1680_v42 = vpack.c.bf16 %v599_v37, %v598_v36  ;;  %v1684_v49 = vpack.c.bf16 %v601_v44, %v600_v43  ;;  %v602_v50 = vld [vmem:[%s2243_s3 + $0x40] sm:$0xff]  ;;  %v603_v51 = vld [vmem:[%s2243_s3 + $0x48] sm:$0xff]  ;;  %v604_v57 = vld [vmem:[%s2243_s3 + $0x50] sm:$0xff] }
   0xe   : > { %s1248_s16 = sshll.u32 %s2249_s9, 3  ;;  %1649 = vmatprep.subr.bf16.mxu0 %v1648_v8  ;;  %1738 = vmatprep.subr.bf16.mxu1 %v1648_v8  ;;  %v1688_v56 = vpack.c.bf16 %v603_v51, %v602_v50  ;;  %v605_v58 = vld [vmem:[%s2243_s3 + $0x58] sm:$0xff]  ;;  %v606_v0 = vld [vmem:[%s2243_s3 + $0x60] sm:$0xff]  ;;  %v607_v1 = vld [vmem:[%s2243_s3 + $0x68] sm:$0xff] }
   0xf   : > { %s1912_s23 = scalar_lea.vmem %s2240_s0, %s1248_s16  ;;  %v1692_v63 = vpack.c.bf16 %v605_v58, %v604_v57  ;;  %v1696_v6 = vpack.c.bf16 %v607_v1, %v606_v0  ;;  %v608_v13 = vld [vmem:[%s2243_s3 + $0x70] sm:$0xff]  ;;  %v609_v14 = vld [vmem:[%s2243_s3 + $0x78] sm:$0xff]  ;;  %v875_v17 = vld [vmem:[%s2245_s5 + $0x8] sm:$0xff]  ;;  %s2177_s13 = scalar_lea.vmem %s2247_s7, %s1248_s16 }
  0x10   : > { %v282_v11 = vld [vmem:[%s1912_s23] sm:$0xff]  ;;  %v283_v31 = vld [vmem:[%s1912_s23 + $0x8] sm:$0xff]  ;;  %v284_v32 = vld [vmem:[%s1912_s23 + $0x10] sm:$0xff] }
  0x11   : > { %1432 = vmatprep.mubr.f32.mxu0 %v282_v11  ;;  %1651 = vmatpush3.bf16.msra.mxu0 %v1648_v8  ;;  %v298_v15 = vld [vmem:[%s1912_s23 + $0x80] sm:$0xff]  ;;  %v299_v33 = vld [vmem:[%s1912_s23 + $0x88] sm:$0xff]  ;;  %v300_v34 = vld [vmem:[%s1912_s23 + $0x90] sm:$0xff] }
  0x12   : > { %1653 = vmatprep.subr.bf16.mxu0 %v1652_v12  ;;  %1746 = vmatpush3.bf16.msra.mxu1 %v1648_v8  ;;  %v285_v38 = vld [vmem:[%s1912_s23 + $0x18] sm:$0xff]  ;;  %v286_v39 = vld [vmem:[%s1912_s23 + $0x20] sm:$0xff]  ;;  %v287_v45 = vld [vmem:[%s1912_s23 + $0x28] sm:$0xff] }
  0x13   : > { %1739 = vmatprep.subr.bf16.mxu1 %v1652_v12  ;;  %1456 = vmatprep.mubr.f32.mxu1 %v298_v15  ;;  %v301_v40 = vld [vmem:[%s1912_s23 + $0x98] sm:$0xff]  ;;  %v302_v41 = vld [vmem:[%s1912_s23 + $0xa0] sm:$0xff]  ;;  %v288_v46 = vld [vmem:[%s1912_s23 + $0x30] sm:$0xff]  ;;  %v1700_v15 = vpack.c.bf16 %v609_v14, %v608_v13 }
  0x14   : > { %v303_v47 = vld [vmem:[%s1912_s23 + $0xa8] sm:$0xff]  ;;  %v304_v48 = vld [vmem:[%s1912_s23 + $0xb0] sm:$0xff]  ;;  %v289_v52 = vld [vmem:[%s1912_s23 + $0x38] sm:$0xff] }
  0x15   : > { %1655 = vmatpush3.bf16.msra.mxu0 %v1652_v12  ;;  %v290_v53 = vld [vmem:[%s1912_s23 + $0x40] sm:$0xff]  ;;  %v305_v54 = vld [vmem:[%s1912_s23 + $0xb8] sm:$0xff]  ;;  %v291_v59 = vld [vmem:[%s1912_s23 + $0x48] sm:$0xff] }
  0x16   : > { %1657 = vmatprep.subr.bf16.mxu0 %v1656_v16  ;;  %1747 = vmatpush3.bf16.msra.mxu1 %v1652_v12  ;;  %v306_v55 = vld [vmem:[%s1912_s23 + $0xc0] sm:$0xff]  ;;  %v292_v60 = vld [vmem:[%s1912_s23 + $0x50] sm:$0xff]  ;;  %v307_v61 = vld [vmem:[%s1912_s23 + $0xc8] sm:$0xff] }
  0x17   : > { %1740 = vmatprep.subr.bf16.mxu1 %v1656_v16  ;;  %v308_v62 = vld [vmem:[%s1912_s23 + $0xd0] sm:$0xff]  ;;  %v293_v2 = vld [vmem:[%s1912_s23 + $0x58] sm:$0xff]  ;;  %v294_v3 = vld [vmem:[%s1912_s23 + $0x60] sm:$0xff] }
  0x18   : > { %v309_v4 = vld [vmem:[%s1912_s23 + $0xd8] sm:$0xff]  ;;  %v310_v5 = vld [vmem:[%s1912_s23 + $0xe0] sm:$0xff]  ;;  %v295_v7 = vld [vmem:[%s1912_s23 + $0x68] sm:$0xff] }
  0x19   : > { %1659 = vmatpush3.bf16.msra.mxu0 %v1656_v16  ;;  %v296_v8 = vld [vmem:[%s1912_s23 + $0x70] sm:$0xff]  ;;  %v311_v9 = vld [vmem:[%s1912_s23 + $0xe8] sm:$0xff]  ;;  %v297_v11 = vld [vmem:[%s1912_s23 + $0x78] sm:$0xff] }
  0x1a   : > { %1661 = vmatprep.subr.bf16.mxu0 %v1660_v19  ;;  %1748 = vmatpush3.bf16.msra.mxu1 %v1656_v16  ;;  %v312_v10 = vld [vmem:[%s1912_s23 + $0xf0] sm:$0xff]  ;;  %v313_v12 = vld [vmem:[%s1912_s23 + $0xf8] sm:$0xff]  ;;  %v874_v16 = vld [vmem:[%s2245_s5] sm:$0xff] }
  0x1b   : > { %1741 = vmatprep.subr.bf16.mxu1 %v1660_v19  ;;  %v876_v18 = vld [vmem:[%s2245_s5 + $0x10] sm:$0xff]  ;;  %v877_v20 = vld [vmem:[%s2245_s5 + $0x18] sm:$0xff]  ;;  %v879_v23 = vld [vmem:[%s2245_s5 + $0x28] sm:$0xff] }
  0x1c   : > { %v1708_v21 = vpack.c.bf16 %v877_v20, %v876_v18  ;;  %v881_v26 = vld [vmem:[%s2245_s5 + $0x38] sm:$0xff]  ;;  %v883_v29 = vld [vmem:[%s2245_s5 + $0x48] sm:$0xff]  ;;  %v2063_v37 = vld [vmem:[%s2242_s2] ss:$0 sm:$0xff] }
  0x1d   : > { %1663 = vmatpush3.bf16.msra.mxu0 %v1660_v19 }
  0x1e   : > { %1665 = vmatprep.subr.bf16.mxu0 %v1664_v22  ;;  %1749 = vmatpush3.bf16.msra.mxu1 %v1660_v19  ;;  %v1704_v19 = vpack.c.bf16 %v875_v17, %v874_v16 }
  0x1f   : > { %1742 = vmatprep.subr.bf16.mxu1 %v1664_v22 }
  0x21   : > { %1667 = vmatpush3.bf16.msra.mxu0 %v1664_v22 }
  0x22   : > { %1669 = vmatprep.subr.bf16.mxu0 %v1668_v25  ;;  %1750 = vmatpush3.bf16.msra.mxu1 %v1664_v22  ;;  %v878_v22 = vld [vmem:[%s2245_s5 + $0x20] sm:$0xff] }
  0x23   : > { %1743 = vmatprep.subr.bf16.mxu1 %v1668_v25  ;;  %v1712_v24 = vpack.c.bf16 %v879_v23, %v878_v22 }
  0x25   : > { %1671 = vmatpush3.bf16.msra.mxu0 %v1668_v25 }
  0x26   : > { %1751 = vmatpush3.bf16.msra.mxu1 %v1668_v25  ;;  %1705 = vmatprep.subr.bf16.mxu0 %v1704_v19  ;;  %v880_v25 = vld [vmem:[%s2245_s5 + $0x30] sm:$0xff] }
  0x27   : > { %1673 = vmatprep.subr.bf16.mxu1 %v1672_v28  ;;  %v1716_v27 = vpack.c.bf16 %v881_v26, %v880_v25 }
  0x28   : > { %1433 = vmatmul.mubr.f32.vlgmr.msra.gmra.mrb[0].mxu0 %v283_v31  ;;  %v884_v31 = vld [vmem:[%s2245_s5 + $0x50] sm:$0xff] }
  0x29   : > { %1435 = vmatprep.mubr.f32.mxu0 %v284_v32  ;;  %1457 = vmatmul.mubr.f32.vlgmr.msra.gmra.mrb[0].mxu1 %v299_v33  ;;  %v885_v32 = vld [vmem:[%s2245_s5 + $0x58] sm:$0xff] }
  0x2a   : > { %1459 = vmatprep.mubr.f32.mxu1 %v300_v34  ;;  %1675 = vmatpush3.bf16.msra.mxu1 %v1672_v28  ;;  %v882_v28 = vld [vmem:[%s2245_s5 + $0x40] sm:$0xff]  ;;  %v1724_v33 = vpack.c.bf16 %v885_v32, %v884_v31 }
  0x2b   : > { %1677 = vmatprep.subr.bf16.mxu1 %v1676_v35  ;;  %1707 = vmatpush3.bf16.msra.mxu0 %v1704_v19  ;;  %v1720_v30 = vpack.c.bf16 %v883_v29, %v882_v28  ;;  %v886_v34 = vld [vmem:[%s2245_s5 + $0x60] sm:$0xff] }
  0x2c   : > { %1436 = vmatmul.mubr.f32.gmra.mrb[2].mxu0 %v285_v38  ;;  %1709 = vmatprep.subr.bf16.mxu0 %v1708_v21 }
  0x2d   : > { %1438 = vmatprep.mubr.f32.mxu0 %v286_v39  ;;  %1460 = vmatmul.mubr.f32.gmra.mrb[2].mxu1 %v301_v40 }
  0x2e   : > { %1462 = vmatprep.mubr.f32.mxu1 %v302_v41  ;;  %1679 = vmatpush3.bf16.msra.mxu1 %v1676_v35  ;;  %v887_v35 = vld [vmem:[%s2245_s5 + $0x68] sm:$0xff] }
  0x2f   : > { %1681 = vmatprep.subr.bf16.mxu1 %v1680_v42  ;;  %1711 = vmatpush3.bf16.msra.mxu0 %v1708_v21  ;;  %v1728_v36 = vpack.c.bf16 %v887_v35, %v886_v34 }
  0x30   : > { %1439 = vmatmul.mubr.f32.gmra.mrb[4].mxu0 %v287_v45  ;;  %1713 = vmatprep.subr.bf16.mxu0 %v1712_v24 }
  0x31   : > { %1441 = vmatprep.mubr.f32.mxu0 %v288_v46  ;;  %1463 = vmatmul.mubr.f32.gmra.mrb[4].mxu1 %v303_v47 }
  0x32   : > { %1465 = vmatprep.mubr.f32.mxu1 %v304_v48  ;;  %1683 = vmatpush3.bf16.msra.mxu1 %v1680_v42 }
  0x33   : > { %1685 = vmatprep.subr.bf16.mxu1 %v1684_v49  ;;  %1715 = vmatpush3.bf16.msra.mxu0 %v1712_v24 }
  0x34   : > { %1442 = vmatmul.mubr.f32.gmra.mrb[6].mxu0 %v289_v52  ;;  %1717 = vmatprep.subr.bf16.mxu0 %v1716_v27 }
  0x35   : > { %1444 = vmatprep.mubr.f32.mxu0 %v290_v53  ;;  %1466 = vmatmul.mubr.f32.gmra.mrb[6].mxu1 %v305_v54 }
  0x36   : > { %1468 = vmatprep.mubr.f32.mxu1 %v306_v55  ;;  %1687 = vmatpush3.bf16.msra.mxu1 %v1684_v49 }
  0x37   : > { %1689 = vmatprep.subr.bf16.mxu1 %v1688_v56  ;;  %1719 = vmatpush3.bf16.msra.mxu0 %v1716_v27 }
  0x38   : > { %1445 = vmatmul.mubr.f32.gmra.mrb[8].mxu0 %v291_v59  ;;  %1721 = vmatprep.subr.bf16.mxu0 %v1720_v30 }
  0x39   : > { %1447 = vmatprep.mubr.f32.mxu0 %v292_v60  ;;  %1469 = vmatmul.mubr.f32.gmra.mrb[8].mxu1 %v307_v61 }
  0x3a   : > { %1471 = vmatprep.mubr.f32.mxu1 %v308_v62  ;;  %1691 = vmatpush3.bf16.msra.mxu1 %v1688_v56 }
  0x3b   : > { %1693 = vmatprep.subr.bf16.mxu1 %v1692_v63  ;;  %1723 = vmatpush3.bf16.msra.mxu0 %v1720_v30 }
  0x3c   : > { %1448 = vmatmul.mubr.f32.gmra.mrb[10].mxu0 %v293_v2  ;;  %1725 = vmatprep.subr.bf16.mxu0 %v1724_v33 }
  0x3d   : > { %1450 = vmatprep.mubr.f32.mxu0 %v294_v3  ;;  %1472 = vmatmul.mubr.f32.gmra.mrb[10].mxu1 %v309_v4 }
  0x3e   : > { %1474 = vmatprep.mubr.f32.mxu1 %v310_v5  ;;  %1695 = vmatpush3.bf16.msra.mxu1 %v1692_v63 }
  0x3f   : > { %1697 = vmatprep.subr.bf16.mxu1 %v1696_v6  ;;  %1727 = vmatpush3.bf16.msra.mxu0 %v1724_v33 }
  0x40   : > { %1451 = vmatmul.mubr.f32.gmra.mrb[12].mxu0 %v295_v7  ;;  %1729 = vmatprep.subr.bf16.mxu0 %v1728_v36 }
  0x41   : > { %1453 = vmatprep.mubr.f32.mxu0 %v296_v8  ;;  %1475 = vmatmul.mubr.f32.gmra.mrb[12].mxu1 %v311_v9 }
  0x42   : > { %1477 = vmatprep.mubr.f32.mxu1 %v312_v10  ;;  %1699 = vmatpush3.bf16.msra.mxu1 %v1696_v6 }
  0x43   : > { %1701 = vmatprep.subr.bf16.mxu1 %v1700_v15  ;;  %1731 = vmatpush3.bf16.msra.mxu0 %v1728_v36 }
  0x44   : > { %1454 = vmatmul.mubr.f32.gmra.mrb[14].mxu0 %v297_v11 }
  0x45   : > { %1478 = vmatmul.mubr.f32.gmra.mrb[14].mxu1 %v313_v12 }
  0x46   : > { %1703 = vmatpush3.bf16.msra.mxu1 %v1700_v15 }
  0xfb   : > { %v1434_v38 = vpop.f32.mrb[0].mxu0 }
  0xfc   : > { %v409_v39 = vadd.f32 %v1434_v38, %v2063_v37  ;;  %v403_v40 = vpop.f32.mrb[1].mxu0  ;;  %v2066_v41 = vpop.f32.mrb[0].mxu1 }
  0xfd   : > { %v404_v42 = vadd.f32 %v2063_v37, %v403_v40  ;;  %v2069_v43 = vpop.f32.mrb[1].mxu1 }
  0xfe   : > { %v563_v46 = vmax.f32 %v409_v39, 0.0  ;;  %v484_v30 = vadd.f32 %v2063_v37, %v2069_v43 }
  0xff   : > { %v562_v44 = vmax.f32 %v404_v42, 0.0  ;;  %v1437_v45 = vpop.f32.mrb[2].mxu0 }
 0x100   : > { %v419_v47 = vadd.f32 %v1437_v45, %v2063_v37  ;;  %v413_v48 = vpop.f32.mrb[3].mxu0  ;;  %v2072_v49 = vpop.f32.mrb[2].mxu1  ;;  %v578_v39 = vmax.f32 %v484_v30, 0.0 }
 0x101   : > { %v414_v50 = vadd.f32 %v2063_v37, %v413_v48  ;;  %1512 = vmatprep.mubr.f32.mxu1 %v562_v44  ;;  %v2075_v51 = vpop.f32.mrb[3].mxu1  ;;  %v489_v44 = vadd.f32 %v2066_v41, %v2063_v37 }
 0x102   : > { %1513 = vmatmul.mubr.f32.vlgmr.msra.gmra.mrb[16].mxu1 %v563_v46  ;;  %v565_v54 = vmax.f32 %v419_v47, 0.0  ;;  %v494_v40 = vadd.f32 %v2063_v37, %v2075_v51  ;;  %v499_v47 = vadd.f32 %v2072_v49, %v2063_v37 }
 0x103   : > { %v564_v52 = vmax.f32 %v414_v50, 0.0  ;;  %v1440_v53 = vpop.f32.mrb[4].mxu0  ;;  %v579_v46 = vmax.f32 %v489_v44, 0.0 }
 0x104   : > { %v429_v55 = vadd.f32 %v1440_v53, %v2063_v37  ;;  %v423_v56 = vpop.f32.mrb[5].mxu0  ;;  %v2078_v57 = vpop.f32.mrb[4].mxu1  ;;  %v580_v43 = vmax.f32 %v494_v40, 0.0  ;;  %v581_v51 = vmax.f32 %v499_v47, 0.0 }
 0x105   : > { %v424_v58 = vadd.f32 %v2063_v37, %v423_v56  ;;  %1515 = vmatprep.mubr.f32.mxu1 %v564_v52  ;;  %v503_v59 = vpop.f32.mrb[5].mxu1  ;;  %v509_v52 = vadd.f32 %v2078_v57, %v2063_v37 }
 0x106   : > { %1516 = vmatmul.mubr.f32.gmra.mrb[18].mxu1 %v565_v54  ;;  %v567_v62 = vmax.f32 %v429_v55, 0.0  ;;  %v504_v45 = vadd.f32 %v2063_v37, %v503_v59 }
 0x107   : > { %v566_v60 = vmax.f32 %v424_v58, 0.0  ;;  %v1443_v61 = vpop.f32.mrb[6].mxu0  ;;  %v583_v54 = vmax.f32 %v509_v52, 0.0 }
 0x108   : > { %v439_v63 = vadd.f32 %v1443_v61, %v2063_v37  ;;  %v433_v0 = vpop.f32.mrb[7].mxu0  ;;  %v2082_v1 = vpop.f32.mrb[6].mxu1  ;;  %v582_v48 = vmax.f32 %v504_v45, 0.0 }
 0x109   : > { %v434_v2 = vadd.f32 %v2063_v37, %v433_v0  ;;  %1518 = vmatprep.mubr.f32.mxu1 %v566_v60  ;;  %v513_v3 = vpop.f32.mrb[7].mxu1  ;;  %v519_v55 = vadd.f32 %v2082_v1, %v2063_v37 }
 0x10a   : > { %1519 = vmatmul.mubr.f32.gmra.mrb[20].mxu1 %v567_v62  ;;  %v569_v6 = vmax.f32 %v439_v63, 0.0  ;;  %v514_v50 = vadd.f32 %v2063_v37, %v513_v3 }
 0x10b   : > { %v568_v4 = vmax.f32 %v434_v2, 0.0  ;;  %v1446_v5 = vpop.f32.mrb[8].mxu0  ;;  %v585_v58 = vmax.f32 %v519_v55, 0.0 }
 0x10c   : > { %v449_v7 = vadd.f32 %v1446_v5, %v2063_v37  ;;  %v443_v8 = vpop.f32.mrb[9].mxu0  ;;  %v2086_v9 = vpop.f32.mrb[8].mxu1  ;;  %v584_v41 = vmax.f32 %v514_v50, 0.0 }
 0x10d   : > { %v444_v10 = vadd.f32 %v2063_v37, %v443_v8  ;;  %1521 = vmatprep.mubr.f32.mxu1 %v568_v4  ;;  %v523_v11 = vpop.f32.mrb[9].mxu1  ;;  %v529_v59 = vadd.f32 %v2086_v9, %v2063_v37  ;;  %v889_v8 = vld [vmem:[%s2245_s5 + $0x78] sm:$0xff] }
 0x10e   : > { %1522 = vmatmul.mubr.f32.gmra.mrb[22].mxu1 %v569_v6  ;;  %v571_v14 = vmax.f32 %v449_v7, 0.0  ;;  %v524_v53 = vadd.f32 %v2063_v37, %v523_v11  ;;  %v888_v7 = vld [vmem:[%s2245_s5 + $0x70] sm:$0xff] }
 0x10f   : > { %v570_v12 = vmax.f32 %v444_v10, 0.0  ;;  %v1449_v13 = vpop.f32.mrb[10].mxu0  ;;  %v587_v61 = vmax.f32 %v529_v59, 0.0  ;;  %v1732_v9 = vpack.c.bf16 %v889_v8, %v888_v7  ;;  %v2127_v10 = vld [vmem:[%s2244_s4] ss:$0 sm:$0xff] }
 0x110   : > { %v459_v15 = vadd.f32 %v1449_v13, %v2063_v37  ;;  %v453_v16 = vpop.f32.mrb[11].mxu0  ;;  %v1473_v17 = vpop.f32.mrb[10].mxu1  ;;  %v586_v49 = vmax.f32 %v524_v53, 0.0 }
 0x111   : > { %v454_v18 = vadd.f32 %v2063_v37, %v453_v16  ;;  %1524 = vmatprep.mubr.f32.mxu1 %v570_v12  ;;  %v533_v19 = vpop.f32.mrb[11].mxu1  ;;  %v539_v62 = vadd.f32 %v1473_v17, %v2063_v37  ;;  %1733 = vmatprep.subr.bf16.mxu0 %v1732_v9 }
 0x112   : > { %1525 = vmatmul.mubr.f32.gmra.mrb[24].mxu1 %v571_v14  ;;  %v573_v22 = vmax.f32 %v459_v15, 0.0  ;;  %v534_v56 = vadd.f32 %v2063_v37, %v533_v19  ;;  %1735 = vmatpush3.bf16.msra.mxu0 %v1732_v9 }
 0x113   : > { %v572_v20 = vmax.f32 %v454_v18, 0.0  ;;  %v1452_v21 = vpop.f32.mrb[12].mxu0  ;;  %v589_v1 = vmax.f32 %v539_v62, 0.0 }
 0x114   : > { %v469_v23 = vadd.f32 %v1452_v21, %v2063_v37  ;;  %v463_v24 = vpop.f32.mrb[13].mxu0  ;;  %v1476_v25 = vpop.f32.mrb[12].mxu1  ;;  %v588_v57 = vmax.f32 %v534_v56, 0.0 }
 0x115   : > { %v464_v26 = vadd.f32 %v2063_v37, %v463_v24  ;;  %1527 = vmatprep.mubr.f32.mxu1 %v572_v20  ;;  %v543_v27 = vpop.f32.mrb[13].mxu1  ;;  %v549_v2 = vadd.f32 %v1476_v25, %v2063_v37 }
 0x116   : > { %1528 = vmatmul.mubr.f32.gmra.mrb[26].mxu1 %v573_v22  ;;  %v575_v31 = vmax.f32 %v469_v23, 0.0  ;;  %v544_v60 = vadd.f32 %v2063_v37, %v543_v27 }
 0x117   : > { %v574_v28 = vmax.f32 %v464_v26, 0.0  ;;  %v1455_v29 = vpop.f32.mrb[14].mxu0  ;;  %v591_v4 = vmax.f32 %v549_v2, 0.0 }
 0x118   : > { %v479_v32 = vadd.f32 %v1455_v29, %v2063_v37  ;;  %v473_v33 = vpop.f32.mrb[15].mxu0  ;;  %v1479_v34 = vpop.f32.mrb[14].mxu1  ;;  %v590_v63 = vmax.f32 %v544_v60, 0.0 }
 0x119   : > { %v474_v35 = vadd.f32 %v2063_v37, %v473_v33  ;;  %1530 = vmatprep.mubr.f32.mxu1 %v574_v28  ;;  %v553_v36 = vpop.f32.mrb[15].mxu1  ;;  %v559_v5 = vadd.f32 %v1479_v34, %v2063_v37 }
 0x11a   : > { %1531 = vmatmul.mubr.f32.gmra.mrb[28].mxu1 %v575_v31  ;;  %v577_v42 = vmax.f32 %v479_v32, 0.0  ;;  %v554_v0 = vadd.f32 %v2063_v37, %v553_v36 }
 0x11b   : > { %v576_v38 = vmax.f32 %v474_v35, 0.0  ;;  %v593_v6 = vmax.f32 %v559_v5, 0.0 }
 0x11c   : > { %v592_v3 = vmax.f32 %v554_v0, 0.0 }
 0x11d   : > { %1533 = vmatprep.mubr.f32.mxu1 %v576_v38 }
 0x11e   : > { %1534 = vmatmul.mubr.f32.gmra.mrb[30].mxu1 %v577_v42 }
 0x11f   : > { %1536 = vmatprep.mubr.f32.mxu1 %v578_v39 }
 0x122   : > { %1537 = vmatmul.mubr.f32.gmra.mrb[32].mxu1 %v579_v46 }
 0x123   : > { %1539 = vmatprep.mubr.f32.mxu1 %v580_v43 }
 0x126   : > { %1540 = vmatmul.mubr.f32.gmra.mrb[34].mxu1 %v581_v51 }
 0x127   : > { %1542 = vmatprep.mubr.f32.mxu1 %v582_v48 }
 0x12a   : > { %1543 = vmatmul.mubr.f32.gmra.mrb[36].mxu1 %v583_v54 }
 0x12b   : > { %1545 = vmatprep.mubr.f32.mxu1 %v584_v41 }
 0x12e   : > { %1546 = vmatmul.mubr.f32.gmra.mrb[38].mxu1 %v585_v58 }
 0x12f   : > { %1548 = vmatprep.mubr.f32.mxu1 %v586_v49 }
 0x132   : > { %1549 = vmatmul.mubr.f32.gmra.mrb[40].mxu1 %v587_v61 }
 0x133   : > { %1551 = vmatprep.mubr.f32.mxu1 %v588_v57 }
 0x136   : > { %1552 = vmatmul.mubr.f32.gmra.mrb[42].mxu1 %v589_v1 }
 0x137   : > { %1554 = vmatprep.mubr.f32.mxu1 %v590_v63 }
 0x13a   : > { %1555 = vmatmul.mubr.f32.gmra.mrb[44].mxu1 %v591_v4 }
 0x13b   : > { %1557 = vmatprep.mubr.f32.mxu1 %v592_v3 }
 0x13e   : > { %1558 = vmatmul.mubr.f32.gmra.mrb[46].mxu1 %v593_v6 }
 0x1d5   : > { %v1514_v37 = vpop.f32.mrb[16].mxu1 }
 0x1d6   : > { %v689_v11 = vadd.f32 %v1514_v37, %v2127_v10  ;;  %v683_v12 = vpop.f32.mrb[17].mxu1 }
 0x1d7   : > { %v684_v13 = vadd.f32 %v2127_v10, %v683_v12 }
 0x1d8   : > { %v843_v16 = vmax.f32 %v689_v11, 0.0 }
 0x1d9   : > { %v842_v14 = vmax.f32 %v684_v13, 0.0  ;;  %v1517_v15 = vpop.f32.mrb[18].mxu1 }
 0x1da   : > { %v699_v17 = vadd.f32 %v1517_v15, %v2127_v10  ;;  %v693_v18 = vpop.f32.mrb[19].mxu1 }
 0x1db   : > { %v694_v19 = vadd.f32 %v2127_v10, %v693_v18  ;;  %1592 = vmatprep.mubr.f32.mxu0 %v842_v14 }
 0x1dc   : > { %1593 = vmatmul.mubr.f32.vlgmr.msra.gmra.mrb[16].mxu0 %v843_v16  ;;  %v845_v22 = vmax.f32 %v699_v17, 0.0 }
 0x1dd   : > { %v844_v20 = vmax.f32 %v694_v19, 0.0  ;;  %v1520_v21 = vpop.f32.mrb[20].mxu1 }
 0x1de   : > { %v709_v23 = vadd.f32 %v1520_v21, %v2127_v10  ;;  %v703_v24 = vpop.f32.mrb[21].mxu1 }
 0x1df   : > { %v704_v25 = vadd.f32 %v2127_v10, %v703_v24  ;;  %1595 = vmatprep.mubr.f32.mxu0 %v844_v20 }
 0x1e0   : > { %1596 = vmatmul.mubr.f32.gmra.mrb[18].mxu0 %v845_v22  ;;  %v847_v28 = vmax.f32 %v709_v23, 0.0 }
 0x1e1   : > { %v846_v26 = vmax.f32 %v704_v25, 0.0  ;;  %v1523_v27 = vpop.f32.mrb[22].mxu1 }
 0x1e2   : > { %v719_v29 = vadd.f32 %v1523_v27, %v2127_v10  ;;  %v713_v30 = vpop.f32.mrb[23].mxu1 }
 0x1e3   : > { %v714_v31 = vadd.f32 %v2127_v10, %v713_v30  ;;  %1598 = vmatprep.mubr.f32.mxu0 %v846_v26 }
 0x1e4   : > { %1599 = vmatmul.mubr.f32.gmra.mrb[20].mxu0 %v847_v28  ;;  %v849_v34 = vmax.f32 %v719_v29, 0.0 }
 0x1e5   : > { %v848_v32 = vmax.f32 %v714_v31, 0.0  ;;  %v1526_v33 = vpop.f32.mrb[24].mxu1 }
 0x1e6   : > { %v729_v35 = vadd.f32 %v1526_v33, %v2127_v10  ;;  %v723_v36 = vpop.f32.mrb[25].mxu1 }
 0x1e7   : > { %v724_v38 = vadd.f32 %v2127_v10, %v723_v36  ;;  %1601 = vmatprep.mubr.f32.mxu0 %v848_v32 }
 0x1e8   : > { %1602 = vmatmul.mubr.f32.gmra.mrb[22].mxu0 %v849_v34  ;;  %v851_v42 = vmax.f32 %v729_v35, 0.0 }
 0x1e9   : > { %v850_v39 = vmax.f32 %v724_v38, 0.0  ;;  %v1529_v40 = vpop.f32.mrb[26].mxu1 }
 0x1ea   : > { %v739_v44 = vadd.f32 %v1529_v40, %v2127_v10  ;;  %v733_v43 = vpop.f32.mrb[27].mxu1 }
 0x1eb   : > { %v734_v45 = vadd.f32 %v2127_v10, %v733_v43  ;;  %1604 = vmatprep.mubr.f32.mxu0 %v850_v39 }
 0x1ec   : > { %1605 = vmatmul.mubr.f32.gmra.mrb[24].mxu0 %v851_v42  ;;  %v853_v48 = vmax.f32 %v739_v44, 0.0 }
 0x1ed   : > { %v852_v46 = vmax.f32 %v734_v45, 0.0  ;;  %v1532_v47 = vpop.f32.mrb[28].mxu1  ;;  %v2164_v45 = vld [vmem:[%s2246_s6] ss:$0 sm:$0xff] }
 0x1ee   : > { %v749_v50 = vadd.f32 %v1532_v47, %v2127_v10  ;;  %v743_v51 = vpop.f32.mrb[29].mxu1 }
 0x1ef   : > { %v744_v52 = vadd.f32 %v2127_v10, %v743_v51  ;;  %1607 = vmatprep.mubr.f32.mxu0 %v852_v46 }
 0x1f0   : > { %1608 = vmatmul.mubr.f32.gmra.mrb[26].mxu0 %v853_v48  ;;  %v855_v54 = vmax.f32 %v749_v50, 0.0 }
 0x1f1   : > { %v854_v41 = vmax.f32 %v744_v52, 0.0  ;;  %v1535_v53 = vpop.f32.mrb[30].mxu1 }
 0x1f2   : > { %v759_v55 = vadd.f32 %v1535_v53, %v2127_v10  ;;  %v753_v49 = vpop.f32.mrb[31].mxu1 }
 0x1f3   : > { %v754_v56 = vadd.f32 %v2127_v10, %v753_v49  ;;  %1610 = vmatprep.mubr.f32.mxu0 %v854_v41 }
 0x1f4   : > { %1611 = vmatmul.mubr.f32.gmra.mrb[28].mxu0 %v855_v54  ;;  %v857_v57 = vmax.f32 %v759_v55, 0.0 }
 0x1f5   : > { %v856_v58 = vmax.f32 %v754_v56, 0.0  ;;  %v1538_v59 = vpop.f32.mrb[32].mxu1 }
 0x1f6   : > { %v769_v60 = vadd.f32 %v1538_v59, %v2127_v10  ;;  %v763_v61 = vpop.f32.mrb[33].mxu1 }
 0x1f7   : > { %v764_v62 = vadd.f32 %v2127_v10, %v763_v61  ;;  %1613 = vmatprep.mubr.f32.mxu0 %v856_v58 }
 0x1f8   : > { %1614 = vmatmul.mubr.f32.gmra.mrb[30].mxu0 %v857_v57  ;;  %v859_v1 = vmax.f32 %v769_v60, 0.0 }
 0x1f9   : > { %v858_v63 = vmax.f32 %v764_v62, 0.0  ;;  %v1541_v0 = vpop.f32.mrb[34].mxu1 }
 0x1fa   : > { %v779_v2 = vadd.f32 %v1541_v0, %v2127_v10  ;;  %v773_v3 = vpop.f32.mrb[35].mxu1 }
 0x1fb   : > { %v774_v4 = vadd.f32 %v2127_v10, %v773_v3  ;;  %1616 = vmatprep.mubr.f32.mxu0 %v858_v63 }
 0x1fc   : > { %1617 = vmatmul.mubr.f32.gmra.mrb[32].mxu0 %v859_v1  ;;  %v861_v7 = vmax.f32 %v779_v2, 0.0 }
 0x1fd   : > { %v860_v5 = vmax.f32 %v774_v4, 0.0  ;;  %v1544_v6 = vpop.f32.mrb[36].mxu1 }
 0x1fe   : > { %v789_v8 = vadd.f32 %v1544_v6, %v2127_v10  ;;  %v783_v9 = vpop.f32.mrb[37].mxu1 }
 0x1ff   : > { %v784_v37 = vadd.f32 %v2127_v10, %v783_v9  ;;  %1619 = vmatprep.mubr.f32.mxu0 %v860_v5 }
 0x200   : > { %1620 = vmatmul.mubr.f32.gmra.mrb[34].mxu0 %v861_v7  ;;  %v863_v13 = vmax.f32 %v789_v8, 0.0 }
 0x201   : > { %v862_v11 = vmax.f32 %v784_v37, 0.0  ;;  %v1547_v12 = vpop.f32.mrb[38].mxu1 }
 0x202   : > { %v799_v14 = vadd.f32 %v1547_v12, %v2127_v10  ;;  %v793_v15 = vpop.f32.mrb[39].mxu1 }
 0x203   : > { %v794_v16 = vadd.f32 %v2127_v10, %v793_v15  ;;  %1622 = vmatprep.mubr.f32.mxu0 %v862_v11 }
 0x204   : > { %1623 = vmatmul.mubr.f32.gmra.mrb[36].mxu0 %v863_v13  ;;  %v865_v19 = vmax.f32 %v799_v14, 0.0 }
 0x205   : > { %v864_v17 = vmax.f32 %v794_v16, 0.0  ;;  %v1550_v18 = vpop.f32.mrb[40].mxu1 }
 0x206   : > { %v809_v20 = vadd.f32 %v1550_v18, %v2127_v10  ;;  %v803_v21 = vpop.f32.mrb[41].mxu1 }
 0x207   : > { %v804_v22 = vadd.f32 %v2127_v10, %v803_v21  ;;  %1625 = vmatprep.mubr.f32.mxu0 %v864_v17 }
 0x208   : > { %1626 = vmatmul.mubr.f32.gmra.mrb[38].mxu0 %v865_v19  ;;  %v867_v25 = vmax.f32 %v809_v20, 0.0 }
 0x209   : > { %v866_v23 = vmax.f32 %v804_v22, 0.0  ;;  %v1553_v24 = vpop.f32.mrb[42].mxu1 }
 0x20a   : > { %v819_v26 = vadd.f32 %v1553_v24, %v2127_v10  ;;  %v813_v27 = vpop.f32.mrb[43].mxu1 }
 0x20b   : > { %v814_v28 = vadd.f32 %v2127_v10, %v813_v27  ;;  %1628 = vmatprep.mubr.f32.mxu0 %v866_v23 }
 0x20c   : > { %1629 = vmatmul.mubr.f32.gmra.mrb[40].mxu0 %v867_v25  ;;  %v869_v31 = vmax.f32 %v819_v26, 0.0 }
 0x20d   : > { %v868_v29 = vmax.f32 %v814_v28, 0.0  ;;  %v1556_v30 = vpop.f32.mrb[44].mxu1 }
 0x20e   : > { %v829_v32 = vadd.f32 %v1556_v30, %v2127_v10  ;;  %v823_v33 = vpop.f32.mrb[45].mxu1 }
 0x20f   : > { %v824_v34 = vadd.f32 %v2127_v10, %v823_v33  ;;  %1631 = vmatprep.mubr.f32.mxu0 %v868_v29 }
 0x210   : > { %1632 = vmatmul.mubr.f32.gmra.mrb[42].mxu0 %v869_v31  ;;  %v871_v38 = vmax.f32 %v829_v32, 0.0 }
 0x211   : > { %v870_v35 = vmax.f32 %v824_v34, 0.0  ;;  %v1559_v36 = vpop.f32.mrb[46].mxu1 }
 0x212   : > { %v839_v39 = vadd.f32 %v1559_v36, %v2127_v10  ;;  %v833_v40 = vpop.f32.mrb[47].mxu1 }
 0x213   : > { %v834_v42 = vadd.f32 %v2127_v10, %v833_v40  ;;  %1634 = vmatprep.mubr.f32.mxu0 %v870_v35 }
 0x214   : > { %1635 = vmatmul.mubr.f32.gmra.mrb[44].mxu0 %v871_v38  ;;  %v873_v43 = vmax.f32 %v839_v39, 0.0 }
 0x215   : > { %v872_v44 = vmax.f32 %v834_v42, 0.0 }
 0x217   : > { %1637 = vmatprep.mubr.f32.mxu0 %v872_v44 }
 0x218   : > { %1638 = vmatmul.mubr.f32.gmra.mrb[46].mxu0 %v873_v43 }
 0x2af   : > { %v1594_v46 = vpop.f32.mrb[16].mxu0 }
 0x2b0   : > { %v969_v47 = vadd.f32 %v1594_v46, %v2164_v45  ;;  %v963_v48 = vpop.f32.mrb[17].mxu0 }
 0x2b1   : > { %v964_v50 = vadd.f32 %v2164_v45, %v963_v48 }
 0x2b2   : > { %1760 = vtanh.f32 %v969_v47 }
 0x2b3   : > { %1762 = vtanh.f32 %v964_v50  ;;  %v1597_v10 = vpop.f32.mrb[18].mxu0 }
 0x2b4   : > { %v979_v51 = vadd.f32 %v1597_v10, %v2164_v45  ;;  %v973_v52 = vpop.f32.mrb[19].mxu0 }
 0x2b5   : > { %v974_v41 = vadd.f32 %v2164_v45, %v973_v52 }
 0x2b6   : > { %1764 = vtanh.f32 %v979_v51 }
 0x2b7   : > { %1766 = vtanh.f32 %v974_v41  ;;  %v1600_v53 = vpop.f32.mrb[20].mxu0 }
 0x2b8   : > { %v989_v54 = vadd.f32 %v1600_v53, %v2164_v45  ;;  %v983_v55 = vpop.f32.mrb[21].mxu0 }
 0x2b9   : > { %v984_v49 = vadd.f32 %v2164_v45, %v983_v55 }
 0x2ba   : > { %1768 = vtanh.f32 %v989_v54 }
 0x2bb   : > { %1770 = vtanh.f32 %v984_v49  ;;  %v1603_v56 = vpop.f32.mrb[22].mxu0 }
 0x2bc   : > { %v1761_v58 = vpop.eup %1760  ;;  %v999_v59 = vadd.f32 %v1603_v56, %v2164_v45  ;;  %v993_v57 = vpop.f32.mrb[23].mxu0 }
 0x2bd   : > { %v1763_v60 = vpop.eup %1762  ;;  %1155 = vst [vmem:[%s2177_s13 + $0x8] sm:$0xff] %v1761_v58  ;;  %v994_v61 = vadd.f32 %v2164_v45, %v993_v57 }
 0x2be   : > { %1154 = vst [vmem:[%s2177_s13] sm:$0xff] %v1763_v60  ;;  %1772 = vtanh.f32 %v999_v59 }
 0x2bf   : > { %1774 = vtanh.f32 %v994_v61  ;;  %v1606_v62 = vpop.f32.mrb[24].mxu0 }
 0x2c0   : > { %v1765_v63 = vpop.eup %1764  ;;  %v1009_v0 = vadd.f32 %v1606_v62, %v2164_v45  ;;  %v1003_v1 = vpop.f32.mrb[25].mxu0 }
 0x2c1   : > { %v1767_v2 = vpop.eup %1766  ;;  %1157 = vst [vmem:[%s2177_s13 + $0x18] sm:$0xff] %v1765_v63  ;;  %v1004_v3 = vadd.f32 %v2164_v45, %v1003_v1 }
 0x2c2   : > { %1156 = vst [vmem:[%s2177_s13 + $0x10] sm:$0xff] %v1767_v2  ;;  %1776 = vtanh.f32 %v1009_v0 }
 0x2c3   : > { %1778 = vtanh.f32 %v1004_v3  ;;  %v1609_v4 = vpop.f32.mrb[26].mxu0 }
 0x2c4   : > { %v1769_v5 = vpop.eup %1768  ;;  %v1019_v6 = vadd.f32 %v1609_v4, %v2164_v45  ;;  %v1013_v7 = vpop.f32.mrb[27].mxu0 }
 0x2c5   : > { %v1771_v8 = vpop.eup %1770  ;;  %1159 = vst [vmem:[%s2177_s13 + $0x28] sm:$0xff] %v1769_v5  ;;  %v1014_v9 = vadd.f32 %v2164_v45, %v1013_v7 }
 0x2c6   : > { %1158 = vst [vmem:[%s2177_s13 + $0x20] sm:$0xff] %v1771_v8  ;;  %1780 = vtanh.f32 %v1019_v6 }
 0x2c7   : > { %1782 = vtanh.f32 %v1014_v9  ;;  %v1612_v37 = vpop.f32.mrb[28].mxu0 }
 0x2c8   : > { %v1773_v11 = vpop.eup %1772  ;;  %v1029_v12 = vadd.f32 %v1612_v37, %v2164_v45  ;;  %v1023_v13 = vpop.f32.mrb[29].mxu0 }
 0x2c9   : > { %v1775_v14 = vpop.eup %1774  ;;  %1161 = vst [vmem:[%s2177_s13 + $0x38] sm:$0xff] %v1773_v11  ;;  %v1024_v15 = vadd.f32 %v2164_v45, %v1023_v13 }
 0x2ca   : > { %1160 = vst [vmem:[%s2177_s13 + $0x30] sm:$0xff] %v1775_v14  ;;  %1784 = vtanh.f32 %v1029_v12 }
 0x2cb   : > { %1786 = vtanh.f32 %v1024_v15  ;;  %v1615_v16 = vpop.f32.mrb[30].mxu0 }
 0x2cc   : > { %v1777_v17 = vpop.eup %1776  ;;  %v1039_v18 = vadd.f32 %v1615_v16, %v2164_v45  ;;  %v1033_v19 = vpop.f32.mrb[31].mxu0 }
 0x2cd   : > { %v1779_v20 = vpop.eup %1778  ;;  %1163 = vst [vmem:[%s2177_s13 + $0x48] sm:$0xff] %v1777_v17  ;;  %v1034_v21 = vadd.f32 %v2164_v45, %v1033_v19 }
 0x2ce   : > { %1162 = vst [vmem:[%s2177_s13 + $0x40] sm:$0xff] %v1779_v20  ;;  %1788 = vtanh.f32 %v1039_v18 }
 0x2cf   : > { %1790 = vtanh.f32 %v1034_v21  ;;  %v1618_v22 = vpop.f32.mrb[32].mxu0 }
 0x2d0   : > { %v1781_v23 = vpop.eup %1780  ;;  %v1049_v24 = vadd.f32 %v1618_v22, %v2164_v45  ;;  %v1043_v25 = vpop.f32.mrb[33].mxu0 }
 0x2d1   : > { %v1783_v26 = vpop.eup %1782  ;;  %1165 = vst [vmem:[%s2177_s13 + $0x58] sm:$0xff] %v1781_v23  ;;  %v1044_v27 = vadd.f32 %v2164_v45, %v1043_v25 }
 0x2d2   : > { %1164 = vst [vmem:[%s2177_s13 + $0x50] sm:$0xff] %v1783_v26  ;;  %1792 = vtanh.f32 %v1049_v24 }
 0x2d3   : > { %1794 = vtanh.f32 %v1044_v27  ;;  %v1621_v28 = vpop.f32.mrb[34].mxu0 }
 0x2d4   : > { %v1785_v29 = vpop.eup %1784  ;;  %v1059_v30 = vadd.f32 %v1621_v28, %v2164_v45  ;;  %v1053_v31 = vpop.f32.mrb[35].mxu0 }
 0x2d5   : > { %v1787_v32 = vpop.eup %1786  ;;  %1167 = vst [vmem:[%s2177_s13 + $0x68] sm:$0xff] %v1785_v29  ;;  %v1054_v33 = vadd.f32 %v2164_v45, %v1053_v31 }
 0x2d6   : > { %1166 = vst [vmem:[%s2177_s13 + $0x60] sm:$0xff] %v1787_v32  ;;  %1796 = vtanh.f32 %v1059_v30 }
 0x2d7   : > { %1798 = vtanh.f32 %v1054_v33  ;;  %v1624_v34 = vpop.f32.mrb[36].mxu0 }
 0x2d8   : > { %v1789_v35 = vpop.eup %1788  ;;  %v1069_v36 = vadd.f32 %v1624_v34, %v2164_v45  ;;  %v1063_v38 = vpop.f32.mrb[37].mxu0 }
 0x2d9   : > { %v1791_v39 = vpop.eup %1790  ;;  %1169 = vst [vmem:[%s2177_s13 + $0x78] sm:$0xff] %v1789_v35  ;;  %v1064_v40 = vadd.f32 %v2164_v45, %v1063_v38 }
 0x2da   : > { %1168 = vst [vmem:[%s2177_s13 + $0x70] sm:$0xff] %v1791_v39  ;;  %1800 = vtanh.f32 %v1069_v36 }
 0x2db   : > { %1802 = vtanh.f32 %v1064_v40  ;;  %v1627_v42 = vpop.f32.mrb[38].mxu0 }
 0x2dc   : > { %v1793_v44 = vpop.eup %1792  ;;  %v1079_v43 = vadd.f32 %v1627_v42, %v2164_v45  ;;  %v1073_v46 = vpop.f32.mrb[39].mxu0 }
 0x2dd   : > { %v1795_v47 = vpop.eup %1794  ;;  %1171 = vst [vmem:[%s2177_s13 + $0x88] sm:$0xff] %v1793_v44  ;;  %v1074_v48 = vadd.f32 %v2164_v45, %v1073_v46 }
 0x2de   : > { %1170 = vst [vmem:[%s2177_s13 + $0x80] sm:$0xff] %v1795_v47  ;;  %1804 = vtanh.f32 %v1079_v43 }
 0x2df   : > { %1806 = vtanh.f32 %v1074_v48  ;;  %v1630_v50 = vpop.f32.mrb[40].mxu0 }
 0x2e0   : > { %v1797_v10 = vpop.eup %1796  ;;  %v1089_v51 = vadd.f32 %v1630_v50, %v2164_v45  ;;  %v1083_v52 = vpop.f32.mrb[41].mxu0 }
 0x2e1   : > { %v1799_v41 = vpop.eup %1798  ;;  %1173 = vst [vmem:[%s2177_s13 + $0x98] sm:$0xff] %v1797_v10  ;;  %v1084_v53 = vadd.f32 %v2164_v45, %v1083_v52 }
 0x2e2   : > { %1172 = vst [vmem:[%s2177_s13 + $0x90] sm:$0xff] %v1799_v41  ;;  %1808 = vtanh.f32 %v1089_v51 }
 0x2e3   : > { %1810 = vtanh.f32 %v1084_v53  ;;  %v1633_v54 = vpop.f32.mrb[42].mxu0 }
 0x2e4   : > { %v1801_v55 = vpop.eup %1800  ;;  %v1099_v49 = vadd.f32 %v1633_v54, %v2164_v45  ;;  %v1093_v56 = vpop.f32.mrb[43].mxu0 }
 0x2e5   : > { %v1803_v58 = vpop.eup %1802  ;;  %1175 = vst [vmem:[%s2177_s13 + $0xa8] sm:$0xff] %v1801_v55  ;;  %v1094_v59 = vadd.f32 %v2164_v45, %v1093_v56 }
 0x2e6   : > { %1174 = vst [vmem:[%s2177_s13 + $0xa0] sm:$0xff] %v1803_v58  ;;  %1812 = vtanh.f32 %v1099_v49 }
 0x2e7   : > { %1814 = vtanh.f32 %v1094_v59  ;;  %v1636_v57 = vpop.f32.mrb[44].mxu0 }
 0x2e8   : > { %v1805_v60 = vpop.eup %1804  ;;  %v1109_v61 = vadd.f32 %v1636_v57, %v2164_v45  ;;  %v1103_v62 = vpop.f32.mrb[45].mxu0 }
 0x2e9   : > { %v1807_v63 = vpop.eup %1806  ;;  %1177 = vst [vmem:[%s2177_s13 + $0xb8] sm:$0xff] %v1805_v60  ;;  %v1104_v0 = vadd.f32 %v2164_v45, %v1103_v62 }
 0x2ea   : > { %1176 = vst [vmem:[%s2177_s13 + $0xb0] sm:$0xff] %v1807_v63  ;;  %1816 = vtanh.f32 %v1109_v61 }
 0x2eb   : > { %1818 = vtanh.f32 %v1104_v0  ;;  %v1639_v1 = vpop.f32.mrb[46].mxu0 }
 0x2ec   : > { %v1809_v2 = vpop.eup %1808  ;;  %v1119_v3 = vadd.f32 %v1639_v1, %v2164_v45  ;;  %v1113_v4 = vpop.f32.mrb[47].mxu0 }
 0x2ed   : > { %v1811_v5 = vpop.eup %1810  ;;  %1179 = vst [vmem:[%s2177_s13 + $0xc8] sm:$0xff] %v1809_v2  ;;  %v1114_v6 = vadd.f32 %v2164_v45, %v1113_v4 }
 0x2ee   : > { %1178 = vst [vmem:[%s2177_s13 + $0xc0] sm:$0xff] %v1811_v5  ;;  %1820 = vtanh.f32 %v1119_v3 }
 0x2ef   : > { %1822 = vtanh.f32 %v1114_v6 }
 0x2f0   : > { %v1813_v7 = vpop.eup %1812 }
 0x2f1   : > { %v1815_v8 = vpop.eup %1814  ;;  %1181 = vst [vmem:[%s2177_s13 + $0xd8] sm:$0xff] %v1813_v7 }
 0x2f2   : > { %1180 = vst [vmem:[%s2177_s13 + $0xd0] sm:$0xff] %v1815_v8 }
 0x2f4   : > { %v1817_v9 = vpop.eup %1816 }
 0x2f5   : > { %v1819_v37 = vpop.eup %1818  ;;  %1183 = vst [vmem:[%s2177_s13 + $0xe8] sm:$0xff] %v1817_v9 }
 0x2f6   : > { %1182 = vst [vmem:[%s2177_s13 + $0xe0] sm:$0xff] %v1819_v37 }
 0x2f8   : > { %v1821_v11 = vpop.eup %1820 }
 0x2f9   : > { %v1823_v12 = vpop.eup %1822  ;;  %1185 = vst [vmem:[%s2177_s13 + $0xf8] sm:$0xff] %v1821_v11 }
 0x2fa   : > { %1184 = vst [vmem:[%s2177_s13 + $0xf0] sm:$0xff] %v1823_v12 }
 0x2fb PF: > { %s17_s24 = sadd.s32 1, %s1830_s24  }
 0x2fc   : > { %p14_p4 = scmp.ge.s32.totalorder %s17_s24, 4  }
 0x2fe   :  { %16 = sbr.rel (!%p14_p4) target bundleno = 1 (0x1), region = 78 }

</bundles_post_ra>
